<compile_context>
chip_gen: v7x
topology: tpu7x:2x2x1
jax: 0.10.0
libtpu: 0.0.40
codegen_flags: <defaults>
</compile_context>

<pallas_src>
import jax
import jax.numpy as jnp
from jax.experimental import pallas as pl
from jax.experimental.pallas import tpu as pltpu

# NOTE: the PyTorch source references `SoftplusPCFF.factor`, but the defined
# constant is `_FACTOR`; the intended scale is this value.
_FACTOR = 1.776091849725427

_LANE = 128
_MAX_TILE_R = 1024  # 1024 x 128 x 4B = 512 KiB per f32 tile


def _softplus(x):
    # Numerically stable softplus == log(1 + exp(x)).
    return jnp.maximum(x, 0.0) + jnp.log1p(jnp.exp(-jnp.abs(x)))


def _eval_kernel(x_ref, o_ref):
    x = x_ref[...].astype(jnp.float32)
    o_ref[...] = _softplus(x).astype(o_ref.dtype)


def _hard_kernel(x_ref, n_ref, o_ref):
    x = x_ref[...].astype(jnp.float32)
    samp = jnp.maximum(n_ref[...] * jnp.float32(_FACTOR) + x, 0.0)
    o_ref[...] = samp.astype(o_ref.dtype)


def _make_mix_kernel(hardness: float):
    def kernel(x_ref, n_ref, u_ref, o_ref):
        x = x_ref[...].astype(jnp.float32)
        samp = jnp.maximum(n_ref[...] * jnp.float32(_FACTOR) + x, 0.0)
        ff = _softplus(x)
        mask = u_ref[...] < jnp.float32(hardness)
        o_ref[...] = jnp.where(mask, samp, ff).astype(o_ref.dtype)

    return kernel


def softplus_pcff(x, *, hardness: float = 0.0, training: bool = False, key=None):
    """Pallas SoftplusPCFF forward. `x` may be any shape (e.g. NCHW)."""
    orig_shape = x.shape
    orig_dtype = x.dtype
    n = x.size

    # Sublane multiple depends on element packing (f32: 8, bf16: 16, int8: 32).
    itemsize = jnp.dtype(orig_dtype).itemsize
    sub = 8 * max(1, 4 // max(1, itemsize))

    rows = pl.cdiv(n, _LANE)
    rows_sub = ((rows + sub - 1) // sub) * sub
    tile_r = min(_MAX_TILE_R, rows_sub)
    rows_p = ((rows_sub + tile_r - 1) // tile_r) * tile_r
    padded = rows_p * _LANE

    xf = jnp.ravel(x)
    if padded != n:  # only materialize a pad copy for ragged sizes
        xf = jnp.pad(xf, (0, padded - n))
    x2 = xf.reshape(rows_p, _LANE)

    spec = pl.BlockSpec((tile_r, _LANE), lambda i: (i, 0))
    grid = (rows_p // tile_r,)

    stochastic = bool(training) and float(hardness) > 0.0
    if not stochastic:
        kernel = _eval_kernel
        inputs = (x2,)
        in_specs = [spec]
    else:
        if key is None:
            key = jax.random.PRNGKey(0)
        # TODO(synk): hardware PRNG (pltpu.prng_seed / prng_random_bits) has no
        # interpret/CPU lowering, so noise is generated outside the kernel.
        if float(hardness) >= 1.0:
            noise = jax.random.normal(key, (rows_p, _LANE), dtype=jnp.float32)
            kernel = _hard_kernel
            inputs = (x2, noise)
            in_specs = [spec, spec]
        else:
            k1, k2 = jax.random.split(key)
            noise = jax.random.normal(k1, (rows_p, _LANE), dtype=jnp.float32)
            u = jax.random.uniform(k2, (rows_p, _LANE), dtype=jnp.float32)
            kernel = _make_mix_kernel(float(hardness))
            inputs = (x2, noise, u)
            in_specs = [spec, spec, spec]

    out2 = pl.pallas_call(
        kernel,
        out_shape=jax.ShapeDtypeStruct((rows_p, _LANE), orig_dtype),
        grid=grid,
        in_specs=in_specs,
        out_specs=spec,
        compiler_params=pltpu.CompilerParams(
            dimension_semantics=("parallel",)),
    )(*inputs)

    out_flat = out2.ravel()
    if padded != n:
        out_flat = out_flat[:n]
    return out_flat.reshape(orig_shape)


if __name__ == "__main__":
    key = jax.random.PRNGKey(0)
    x = jax.random.normal(key, (2, 4, 16, 16), dtype=jnp.float32)  # NCHW

    # Deterministic path (eval / hardness == 0): must match softplus.
    y_eval = softplus_pcff(x, hardness=0.7, training=False)
    jax.block_until_ready(y_eval)
    assert y_eval.shape == x.shape
    assert jnp.allclose(y_eval, jax.nn.softplus(x), atol=1e-5), "softplus path mismatch"

    # Fully-hard path (training, hardness >= 1): relu(noise*FACTOR + x).
    y_hard = softplus_pcff(x, hardness=1.0, training=True, key=jax.random.PRNGKey(42))
    jax.block_until_ready(y_hard)
    assert y_hard.shape == x.shape
    assert bool(jnp.all(y_hard >= 0.0)), "hard path must be non-negative (relu)"
    assert bool(jnp.any(y_hard == 0.0)), "hard path should clip some values to 0"
    assert bool(jnp.any(y_hard > 0.0)), "hard path should pass some values"

    # Mixture path (training, 0 < hardness < 1): blend of softplus and samples.
    y_mix = softplus_pcff(x, hardness=0.5, training=True, key=jax.random.PRNGKey(1234))
    jax.block_until_ready(y_mix)
    assert y_mix.shape == x.shape
    assert bool(jnp.all(y_mix >= 0.0)), "mixture outputs must be non-negative"
    frac_ff = float(jnp.mean(
        jnp.isclose(y_mix, jax.nn.softplus(x), atol=1e-5).astype(jnp.float32)))
    assert 0.2 < frac_ff < 0.8, "mixture should blend softplus and sampled branches"

    print("KERNEL_OK")
</pallas_src>

<mosaic_0001>
module attributes {stable_mosaic.version = 11 : i64} {
  func.func @_eval_kernel(%arg0: i32, %arg1: memref<16x128xf32, #tpu.memory_space<vmem>>, %arg2: memref<16x128xf32, #tpu.memory_space<vmem>>) attributes {dimension_semantics = [#tpu.dimension_semantics<parallel>], iteration_bounds = array<i64: 1>, scalar_prefetch = 0 : i64, scratch_operands = 0 : i64, tpu.core_type = #tpu.core_type<tc>, window_params = [{transform_indices = @transform_0, window_bounds = array<i64: 16, 128>}, {transform_indices = @transform_1, window_bounds = array<i64: 16, 128>}]} {
    %c0 = arith.constant 0 : index
    %c0_0 = arith.constant 0 : index
    %0 = vector.load %arg1[%c0, %c0_0] : memref<16x128xf32, #tpu.memory_space<vmem>>, vector<16x128xf32>
    %cst = arith.constant 0.000000e+00 : f32
    %1 = vector.broadcast %cst : f32 to vector<16x128xf32>
    %2 = arith.maximumf %0, %1 : vector<16x128xf32>
    %3 = math.absf %0 : vector<16x128xf32>
    %cst_1 = arith.constant 0.000000e+00 : f32
    %4 = vector.broadcast %cst_1 : f32 to vector<16x128xf32>
    %5 = arith.subf %4, %3 : vector<16x128xf32>
    %6 = math.exp %5 : vector<16x128xf32>
    %7 = math.log1p %6 : vector<16x128xf32>
    %8 = arith.addf %2, %7 : vector<16x128xf32>
    %c0_2 = arith.constant 0 : index
    %c0_3 = arith.constant 0 : index
    %9 = vector.load %arg2[%c0_2, %c0_3] : memref<16x128xf32, #tpu.memory_space<vmem>>, vector<16x128xf32>
    tpu.vector_store %arg2[%c0_2, %c0_3], %8 {strides = array<i32>} : memref<16x128xf32, #tpu.memory_space<vmem>>, vector<16x128xf32>,
    return
  }
  func.func @transform_0(%arg0: i32) -> (i32, i32) {
    %c0_i32 = arith.constant 0 : i32
    %c0_i32_0 = arith.constant 0 : i32
    return %arg0, %c0_i32 : i32, i32
  }
  func.func @transform_1(%arg0: i32) -> (i32, i32) {
    %c0_i32 = arith.constant 0 : i32
    %c0_i32_0 = arith.constant 0 : i32
    return %arg0, %c0_i32 : i32, i32
  }
}

</mosaic_0001>

<bundles_post_ra>
// kernel: tpu_custom_call.1
= control target key start
LH: loop header
LB: loop body
LE: loop exit
PB: predicated region body
PF: predicated region fallthrough
CT: control target
= control target key end

     0   :  { %6 = vsyncpa [#allocation3], 0  ;;  %s178_s0 = inlined_call_operand.hbm [shape: f32[16,128], index: 0, kind: input, shape index: {}]   ;;  %s179_s1 = inlined_call_operand.hbm [shape: f32[16,128], index: 1, kind: output, shape index: {}]  }
   0x1   :  { %7 = vsyncpa [#allocation4], 0  ;;  %s134_s6 = smov [#allocation2]   ;;  %s86_s10 = scalar_lea.hbm %s178_s0, 256 }
   0x2   :  { %s13_s7 = sshll.u32 %s134_s6, 4  ;;  %p87_p0 = scmp.ne.s32.totalorder %s178_s0, %s86_s10  ;;  %s14_s7 = int_to_ptr.vmem [resolvable:$true] %s13_s7 }
   0x3   :  { %p90_p1 = scmp.lt.u32.totalorder %s86_s10, %s178_s0 }
   0x5   :  { %p92_p2 = pnand %p90_p1, %p87_p0 }
   0x7   :  { %95 = shalt.err (!%p92_p2)
}
   0x8   :  { %s96_s15 = scalar_lea.vmem %s14_s7, 256  ;;  %p101_p4 = scmp.lt.s32.totalorder %s14_s7, %s14_s7 }
   0x9   :  { %p97_p3 = scmp.ne.s32.totalorder %s14_s7, %s96_s15  ;;  %p102_p5 = scmp.lt.s32.totalorder %s96_s15, %s96_s15 }
   0xb   :  { %p103_p6 = por %p102_p5, %p101_p4 }
   0xd   :  { %p104_p7 = pnand %p103_p6, %p97_p3 }
   0xf   :  { %107 = shalt.err (!%p104_p7)
}
  0x10   :  { %s135_s16 = smov 128   ;;  %s136_s17 = smov 8  }
  0x11   :  { %19 = dma.hbm_to_vmem [thread:$0]  %s178_s0, 256, %s14_s7, [#allocation3], %s135_s16, %s135_s16, %s136_s17  }
  0x12   :  { %130 = dma.done.wait [#allocation3], 256  }
  0x13   :  { %131 = vsyncadd [#allocation3], 4294967040  ;;  %v23_v0 = vld [vmem:[#allocation2] sm:$0xff]  ;;  %v24_v1 = vld [vmem:[#allocation2 + $0x8] sm:$0xff]  ;;  %s137_s0 = smov [#allocation5]  }
  0x14   :  { %v27_v2 = vand.u32 2147483647, %v23_v0  ;;  %v28_v3 = vand.u32 2147483647, %v24_v1  ;;  %v25_v20 = vmax.f32 %v23_v0, 0.0  ;;  %v26_v24 = vmax.f32 %v24_v1, 0.0 }
  0x15   :  { %s62_s20 = sshll.u32 %s137_s0, 4  ;;  %s63_s20 = int_to_ptr.vmem [resolvable:$true] %s62_s20 }
  0x16   :  { %v29_v4 = vsub.f32 0.0, %v27_v2  ;;  %v30_v5 = vsub.f32 0.0, %v28_v3  ;;  %s108_s21 = scalar_lea.vmem %s63_s20, 256  ;;  %p113_p9 = scmp.lt.s32.totalorder %s63_s20, %s63_s20 }
  0x17   :  { %p109_p8 = scmp.ne.s32.totalorder %s63_s20, %s108_s21  ;;  %p114_p10 = scmp.lt.s32.totalorder %s108_s21, %s108_s21 }
  0x18   :  { %v31_v6 = vmul.f32 1.442695, %v29_v4  ;;  %v33_v7 = vmul.f32 1.442695, %v30_v5 }
  0x19   :  { %p115_p11 = por %p114_p10, %p113_p9 }
  0x1a   :  { %78 = vpow2.f32 %v31_v6 }
  0x1b   :  { %80 = vpow2.f32 %v33_v7  ;;  %p116_p12 = pnand %p115_p11, %p109_p8 }
  0x24   :  { %v79_v8 = vpop.eup %78 }
  0x25   :  { %v81_v9 = vpop.eup %80  ;;  %v35_v10 = vadd.f32 1.0, %v79_v8  ;;  %v38_v12 = vmul.f32 -0.5, %v79_v8  ;;  %v41_v15 = vand.u32 2147483647, %v79_v8 }
  0x26   :  { %v44_v11 = vadd.f32 1.0, %v81_v9  ;;  %v47_v13 = vmul.f32 -0.5, %v81_v9  ;;  %v50_v17 = vand.u32 2147483647, %v81_v9 }
  0x27   :  { %82 = vlog2.f32 %v35_v10  ;;  %v39_v14 = vadd.f32 1.0, %v38_v12  ;;  %vm42_vm0 = vcmp.lt.f32.partialorder %v41_v15, 0.0004427343 }
  0x28   :  { %84 = vlog2.f32 %v44_v11  ;;  %v48_v16 = vadd.f32 1.0, %v47_v13  ;;  %vm51_vm1 = vcmp.lt.f32.partialorder %v50_v17, 0.0004427343 }
  0x29   :  { %v40_v18 = vmul.f32 %v79_v8, %v39_v14 }
  0x2a   :  { %v49_v21 = vmul.f32 %v81_v9, %v48_v16 }
  0x31   :  { %v83_v19 = vpop.eup %82 }
  0x32   :  { %v85_v22 = vpop.eup %84  ;;  %v37_v23 = vmul.f32 0.6931472, %v83_v19 }
  0x33   :  { %v46_v25 = vmul.f32 0.6931472, %v85_v22 }
  0x34   :  { %v43_v26 = vsel %vm42_vm0, %v40_v18, %v37_v23 }
  0x35   :  { %v53_v27 = vadd.f32 %v43_v26, %v25_v20  ;;  %v52_v28 = vsel %vm51_vm1, %v49_v21, %v46_v25 }
  0x36   :  { %v54_v29 = vadd.f32 %v52_v28, %v26_v24 }
  0x37   :  { %55 = vst [vmem:[#allocation5] sm:$0xff] %v53_v27 }
  0x38   :  { %56 = vst [vmem:[#allocation5 + $0x8] sm:$0xff] %v54_v29 }
  0x39   :  { %119 = shalt.err (!%p116_p12)
}
  0x3a   :  { %s120_s24 = scalar_lea.hbm %s179_s1, 256 }
  0x3b   :  { %p121_p13 = scmp.ne.s32.totalorder %s179_s1, %s120_s24  ;;  %p124_p0 = scmp.lt.u32.totalorder %s120_s24, %s179_s1 }
  0x3d   :  { %p126_p1 = pnand %p124_p0, %p121_p13 }
  0x3f   :  { %129 = shalt.err (!%p126_p1)
}
  0x40   :  { %68 = dma.vmem_to_hbm [thread:$0]  %s63_s20, 256, %s179_s1, [#allocation4], %s135_s16, %s135_s16, %s136_s17  }
  0x41   :  { %132 = dma.done.wait [#allocation4], 256  }
  0x42   :  { %133 = vsyncadd [#allocation4], 4294967040 }
  0x43   :  { %72 = vsyncpa [#allocation3], 1 }
  0x44   :  { %73 = vsyncpa [#allocation4], 1 }

</bundles_post_ra>
